<compile_context>
chip_gen: v7x
topology: tpu7x:2x2x1
jax: 0.10.0
libtpu: 0.0.40
codegen_flags: <defaults>
</compile_context>

<pallas_src>
import functools
import math

import jax
import jax.numpy as jnp
from jax.experimental import pallas as pl
from jax.experimental.pallas import tpu as pltpu

_LANES = 128
_SUBLANES = 8
_VMEM_BUDGET = 32 * 1024 * 1024   # target per-step double-buffered working set
_VMEM_LIMIT = 48 * 1024 * 1024    # explicit scoped-VMEM limit (fits v7x's 64 MiB)


def _divisible_select_kernel(*refs, plans):
    """Divisible-T path. plans: (mode, C) per field; refs = ins then outs."""
    n = len(plans)
    in_refs, out_refs = refs[:n], refs[n:]
    for (mode, c), x_ref, o_ref in zip(plans, in_refs, out_refs):
        if mode == "copy":
            # The input BlockSpec already DMA'd only the kept lanes (first C
            # lanes of each fused [stride*C] row): lane-dense full-tile copy.
            o_ref[...] = x_ref[...]
        else:  # "lane_slice": tiny field; keep first C lanes of each fused row.
            o_ref[...] = x_ref[:, :, 0:c]


def _strided_select_kernel(*refs, plans):
    """Ragged-T fallback: in-register sublane-strided gather (32-bit dtypes)."""
    n = len(plans)
    in_refs, out_refs = refs[:n], refs[n:]
    for (num_out, stride), x_ref, o_ref in zip(plans, in_refs, out_refs):
        o_ref[...] = x_ref[:, pl.ds(0, num_out, stride=stride), :]


def _pick_tile(total, unit_bytes, budget, sublane_multiple=False):
    """Largest divisor of `total` (a multiple of 8 or == total if requested)
    whose tile * unit_bytes fits the budget; else the smallest legal one."""
    cands = [d for d in range(1, total + 1) if total % d == 0]
    if sublane_multiple:
        cands = [d for d in cands if d % _SUBLANES == 0 or d == total]
    fitting = [d for d in cands if d * max(unit_bytes, 1) <= budget]
    return max(fitting) if fitting else min(cands)


def _select_group_divisible(arrays, stride):
    """T % stride == 0: stride handled entirely at the DMA/BlockSpec level."""
    B, T = arrays[0].shape[0], arrays[0].shape[1]
    S = T // stride

    plans, flat_inputs, in_lasts, chans, trails = [], [], [], [], []
    for arr in arrays:
        trail = arr.shape[2:]
        C = math.prod(trail)
        x_in = arr.reshape(B, S, stride * C)        # free row-major view
        if C % _LANES == 0:
            mode, in_last = "copy", C               # DMA reads only kept lanes
        else:
            mode, in_last = "lane_slice", stride * C
        plans.append((mode, C))
        flat_inputs.append(x_in)
        in_lasts.append(in_last)
        chans.append(C)
        trails.append(trail)

    # Double-buffered in+out bytes per (batch row, kept sample).
    per_bs = sum(2 * (il + c) * a.dtype.itemsize
                 for il, c, a in zip(in_lasts, chans, arrays))
    b_blk = _pick_tile(B, S * per_bs, _VMEM_BUDGET)
    s_blk = _pick_tile(S, b_blk * per_bs, _VMEM_BUDGET, sublane_multiple=True)
    grid = (B // b_blk, S // s_blk)

    idx = lambda b, s: (b, s, 0)
    in_specs = [pl.BlockSpec((b_blk, s_blk, il), idx) for il in in_lasts]
    out_specs = tuple(pl.BlockSpec((b_blk, s_blk, c), idx) for c in chans)
    out_shapes = tuple(jax.ShapeDtypeStruct((B, S, c), a.dtype)
                       for c, a in zip(chans, arrays))

    kernel = functools.partial(_divisible_select_kernel, plans=tuple(plans))
    outs = pl.pallas_call(
        kernel,
        out_shape=out_shapes,
        grid_spec=pltpu.PrefetchScalarGridSpec(
            num_scalar_prefetch=0,
            grid=grid,
            in_specs=in_specs,
            out_specs=out_specs,
        ),
        compiler_params=pltpu.CompilerParams(
            dimension_semantics=("parallel", "parallel"),
            vmem_limit_bytes=_VMEM_LIMIT,
        ),
    )(*flat_inputs)

    return [y.reshape((B, S) + trail) for y, trail in zip(outs, trails)]


def _select_group_ragged(arrays, stride):
    """T % stride != 0, 32-bit dtypes: in-kernel sublane-strided gather."""
    B, T = arrays[0].shape[0], arrays[0].shape[1]
    num_out = -(-T // stride)                 # == len(np.arange(0, T, stride))

    plans, flat_inputs, chans, trails = [], [], [], []
    for arr in arrays:
        trail = arr.shape[2:]
        C = math.prod(trail)
        flat_inputs.append(arr.reshape(B, T, C))
        plans.append((num_out, stride))
        chans.append(C)
        trails.append(trail)

    per_b = sum(2 * (T + num_out) * c * a.dtype.itemsize
                for c, a in zip(chans, arrays))
    b_blk = _pick_tile(B, per_b, _VMEM_BUDGET)
    grid = (B // b_blk,)

    idx = lambda b: (b, 0, 0)
    in_specs = [pl.BlockSpec((b_blk, T, c), idx) for c in chans]
    out_specs = tuple(pl.BlockSpec((b_blk, num_out, c), idx) for c in chans)
    out_shapes = tuple(jax.ShapeDtypeStruct((B, num_out, c), a.dtype)
                       for c, a in zip(chans, arrays))

    kernel = functools.partial(_strided_select_kernel, plans=tuple(plans))
    outs = pl.pallas_call(
        kernel,
        out_shape=out_shapes,
        grid_spec=pltpu.PrefetchScalarGridSpec(
            num_scalar_prefetch=0,
            grid=grid,
            in_specs=in_specs,
            out_specs=out_specs,
        ),
        compiler_params=pltpu.CompilerParams(
            dimension_semantics=("parallel",),
            vmem_limit_bytes=_VMEM_LIMIT,
        ),
    )(*flat_inputs)

    return [y.reshape((B, num_out) + trail) for y, trail in zip(outs, trails)]


def _select_group(arrays, stride):
    """Strided select along dim 1 for [B, T, ...] arrays sharing (B, T)."""
    T = arrays[0].shape[1]
    if T % stride == 0:
        return _select_group_divisible(arrays, stride)
    if any(a.dtype.itemsize < 4 for a in arrays):
        # TODO(synk): ragged T + packed dtypes: a sublane-strided gather crosses
        # packed sublane pairs; XLA's strided slice is already ~roofline for
        # this zero-FLOP copy, so fall back instead of faking it.
        return [a[:, ::stride] for a in arrays]
    return _select_group_ragged(arrays, stride)


class SelectPointsEmbedding:
    """JAX/Pallas port of nlf.embedding.point.SelectPointsEmbedding (no params)."""

    def __init__(self, in_channels, cfg, **kwargs):
        self.group = cfg.get('group', kwargs.get('group', 'embedding'))
        self.cfg = cfg
        self.fields = cfg['fields']
        self.cur_iter = 0

    def __call__(self, x, render_kwargs=None):
        # total_samples / num_samples are static, host-side scalars (the torch
        # module builds a host-side np.arange from them).
        total_num_samples = int(x['total_samples'])
        num_samples = int(x['num_samples'])
        stride = int(total_num_samples / num_samples)   # float-div + trunc, as in torch
        out = dict(x)
        if stride <= 1:
            return out                                   # arange(0, T, 1): identity
        # Group selected fields by (B, T): one fused pallas_call per group so
        # tiny fields (viewdirs) don't pay their own launch + pipeline cost.
        groups = {}
        for key in x.keys():
            if key in self.fields:
                arr = x[key]
                groups.setdefault((arr.shape[0], arr.shape[1]), []).append(key)
        for keys in groups.values():
            results = _select_group([x[k] for k in keys], stride)
            for k, r in zip(keys, results):
                out[k] = r
        return out

    def set_iter(self, i):
        self.cur_iter = i


if __name__ == "__main__":
    key = jax.random.PRNGKey(0)
    k1, k2, k3, k4 = jax.random.split(key, 4)

    # --- Case 1: divisible T; one wide field (copy mode, C=128) and one tiny
    # field (lane_slice mode, C=4) fused into a single pallas_call. ---
    B, T, S = 2, 16, 8            # total_samples=16, num_samples=8 -> stride=2
    points = jax.random.normal(k1, (B, T, 128), dtype=jnp.float32)
    viewdirs = jax.random.normal(k2, (B, T, 4), dtype=jnp.float32)
    weights = jax.random.normal(k3, (B, T), dtype=jnp.float32)   # not a field

    cfg = {'fields': ['points', 'viewdirs'], 'group': 'embedding'}
    module = SelectPointsEmbedding(in_channels=128, cfg=cfg)

    x = {
        'points': points,
        'viewdirs': viewdirs,
        'weights': weights,
        'total_samples': T,
        'num_samples': S,
    }
    out = module(x, render_kwargs={})
    jax.block_until_ready(out['points'])
    jax.block_until_ready(out['viewdirs'])

    stride = int(T / S)
    assert out['points'].shape == (B, S, 128)
    assert out['viewdirs'].shape == (B, S, 4)
    assert jnp.array_equal(out['points'], points[:, ::stride])
    assert jnp.array_equal(out['viewdirs'], viewdirs[:, ::stride])
    # Non-field keys pass through untouched.
    assert out['weights'].shape == (B, T)
    assert out['total_samples'] == T and out['num_samples'] == S

    # --- Case 2: divisible T with trailing dims (exercises the flatten /
    # restore path and a non-128-multiple channel count). ---
    B2, T2, S2 = 2, 12, 4         # stride = 3
    feats = jax.random.normal(k4, (B2, T2, 3, 8), dtype=jnp.float32)
    module2 = SelectPointsEmbedding(in_channels=24, cfg={'fields': ['feats']})
    out2 = module2({'feats': feats, 'total_samples': T2, 'num_samples': S2},
                   render_kwargs={})
    jax.block_until_ready(out2['feats'])
    assert out2['feats'].shape == (B2, S2, 3, 8)
    assert jnp.array_equal(out2['feats'], feats[:, ::3])

    print("KERNEL_OK")
</pallas_src>

<mosaic_0001>
module attributes {stable_mosaic.version = 11 : i64} {
  func.func @_divisible_select_kernel(%arg0: i32, %arg1: i32, %arg2: memref<2x8x128xf32, #tpu.memory_space<vmem>>, %arg3: memref<2x8x8xf32, #tpu.memory_space<vmem>>, %arg4: memref<2x8x128xf32, #tpu.memory_space<vmem>>, %arg5: memref<2x8x4xf32, #tpu.memory_space<vmem>>) attributes {dimension_semantics = [#tpu.dimension_semantics<parallel>, #tpu.dimension_semantics<parallel>], iteration_bounds = array<i64: 1, 1>, scalar_prefetch = 0 : i64, scratch_operands = 0 : i64, tpu.core_type = #tpu.core_type<tc>, window_params = [{transform_indices = @transform_0, window_bounds = array<i64: 2, 8, 128>}, {transform_indices = @transform_1, window_bounds = array<i64: 2, 8, 8>}, {transform_indices = @transform_2, window_bounds = array<i64: 2, 8, 128>}, {transform_indices = @transform_3, window_bounds = array<i64: 2, 8, 4>}]} {
    %c0 = arith.constant 0 : index
    %c0_0 = arith.constant 0 : index
    %c0_1 = arith.constant 0 : index
    %0 = vector.load %arg2[%c0, %c0_0, %c0_1] : memref<2x8x128xf32, #tpu.memory_space<vmem>>, vector<2x8x128xf32>
    %c0_2 = arith.constant 0 : index
    %c0_3 = arith.constant 0 : index
    %c0_4 = arith.constant 0 : index
    %1 = vector.load %arg4[%c0_2, %c0_3, %c0_4] : memref<2x8x128xf32, #tpu.memory_space<vmem>>, vector<2x8x128xf32>
    tpu.vector_store %arg4[%c0_2, %c0_3, %c0_4], %0 {strides = array<i32>} : memref<2x8x128xf32, #tpu.memory_space<vmem>>, vector<2x8x128xf32>,
    %c0_5 = arith.constant 0 : index
    %c0_6 = arith.constant 0 : index
    %c0_7 = arith.constant 0 : index
    %2 = vector.load %arg3[%c0_5, %c0_6, %c0_7] : memref<2x8x8xf32, #tpu.memory_space<vmem>>, vector<2x8x4xf32>
    %c0_8 = arith.constant 0 : index
    %c0_9 = arith.constant 0 : index
    %c0_10 = arith.constant 0 : index
    %3 = vector.load %arg5[%c0_8, %c0_9, %c0_10] : memref<2x8x4xf32, #tpu.memory_space<vmem>>, vector<2x8x4xf32>
    tpu.vector_store %arg5[%c0_8, %c0_9, %c0_10], %2 {strides = array<i32>} : memref<2x8x4xf32, #tpu.memory_space<vmem>>, vector<2x8x4xf32>,
    return
  }
  func.func @transform_0(%arg0: i32, %arg1: i32) -> (i32, i32, i32) {
    %c0_i32 = arith.constant 0 : i32
    %c0_i32_0 = arith.constant 0 : i32
    return %arg0, %arg1, %c0_i32 : i32, i32, i32
  }
  func.func @transform_1(%arg0: i32, %arg1: i32) -> (i32, i32, i32) {
    %c0_i32 = arith.constant 0 : i32
    %c0_i32_0 = arith.constant 0 : i32
    return %arg0, %arg1, %c0_i32 : i32, i32, i32
  }
  func.func @transform_2(%arg0: i32, %arg1: i32) -> (i32, i32, i32) {
    %c0_i32 = arith.constant 0 : i32
    %c0_i32_0 = arith.constant 0 : i32
    return %arg0, %arg1, %c0_i32 : i32, i32, i32
  }
  func.func @transform_3(%arg0: i32, %arg1: i32) -> (i32, i32, i32) {
    %c0_i32 = arith.constant 0 : i32
    %c0_i32_0 = arith.constant 0 : i32
    return %arg0, %arg1, %c0_i32 : i32, i32, i32
  }
}

</mosaic_0001>

<bundles_post_ra>
// kernel: tpu_custom_call.1
= control target key start
LH: loop header
LB: loop body
LE: loop exit
PB: predicated region body
PF: predicated region fallthrough
CT: control target
= control target key end

     0   :  { %9 = vsyncpa [#allocation3], 0  ;;  %s230_s0 = inlined_call_operand.hbm [shape: f32[2,8,256], index: 0, kind: input, shape index: {}]   ;;  %s231_s1 = inlined_call_operand.hbm [shape: f32[2,8,8], index: 1, kind: input, shape index: {}]   ;;  %s232_s2 = inlined_call_operand.hbm [shape: f32[2,8,128], index: 2, kind: output, shape index: {0}]   ;;  %s233_s3 = inlined_call_operand.vmem [shape: f32[2,8,4], index: 3, kind: output, shape index: {1}]  }
   0x1   :  { %10 = vsyncpa [#allocation6], 0 }
   0x2   :  { %11 = vsyncpa [#allocation4], 0  ;;  %s151_s12 = smov [#allocation2]   ;;  %s79_s16 = scalar_lea.hbm %s230_s0, 256 }
   0x3   :  { %s17_s13 = sshll.u32 %s151_s12, 4  ;;  %p80_p0 = scmp.ne.s32.totalorder %s230_s0, %s79_s16  ;;  %s18_s13 = int_to_ptr.vmem [resolvable:$true] %s17_s13 }
   0x4   :  { %s81_s21 = scalar_lea.hbm %s230_s0, 512  ;;  %p83_p2 = scmp.lt.u32.totalorder %s79_s16, %s230_s0 }
   0x5   :  { %p82_p1 = scmp.lt.u32.totalorder %s81_s21, %s79_s16 }
   0x7   :  { %p84_p3 = por %p83_p2, %p82_p1 }
   0x9   :  { %p85_p4 = pnand %p84_p3, %p80_p0 }
   0xb   :  { %88 = shalt.err (!%p85_p4)
}
   0xc   :  { %s89_s24 = scalar_lea.vmem %s18_s13, 256  ;;  %p94_p6 = scmp.lt.s32.totalorder %s18_s13, %s18_s13 }
   0xd   :  { %p90_p5 = scmp.ne.s32.totalorder %s18_s13, %s89_s24  ;;  %p95_p7 = scmp.lt.s32.totalorder %s89_s24, %s89_s24 }
   0xf   :  { %p96_p8 = por %p95_p7, %p94_p6 }
  0x11   :  { %p97_p9 = pnand %p96_p8, %p90_p5 }
  0x13   :  { %100 = shalt.err (!%p97_p9)
}
  0x14   :  { %s152_s25 = smov 256   ;;  %s153_s26 = smov 128  }
  0x15   :  { %s154_s27 = smov 8   ;;  %s155_s30 = smov [#allocation5]  }
  0x16   :  { %23 = dma.hbm_to_vmem [thread:$0]  %s230_s0, 256, %s18_s13, [#allocation3], %s152_s25, %s153_s26, %s154_s27  }
  0x17   :  { %s29_s4 = sshll.u32 %s155_s30, 4  ;;  %s101_s7 = scalar_lea.hbm %s231_s1, 256  ;;  %s30_s4 = int_to_ptr.vmem [resolvable:$true] %s29_s4 }
  0x18   :  { %p102_p10 = scmp.ne.s32.totalorder %s231_s1, %s101_s7  ;;  %p105_p11 = scmp.lt.u32.totalorder %s101_s7, %s231_s1 }
  0x1a   :  { %p107_p12 = pnand %p105_p11, %p102_p10 }
  0x1c   :  { %110 = shalt.err (!%p107_p12)
}
  0x1d   :  { %s111_s12 = scalar_lea.vmem %s30_s4, 256  ;;  %p116_p0 = scmp.lt.s32.totalorder %s30_s4, %s30_s4 }
  0x1e   :  { %p112_p13 = scmp.ne.s32.totalorder %s30_s4, %s111_s12  ;;  %p117_p1 = scmp.lt.s32.totalorder %s111_s12, %s111_s12 }
  0x20   :  { %p118_p2 = por %p117_p1, %p116_p0 }
  0x22   :  { %p119_p3 = pnand %p118_p2, %p112_p13 }
  0x24   :  { %122 = shalt.err (!%p119_p3)
}
  0x25   :  { %35 = dma.hbm_to_vmem [thread:$0]  %s231_s1, 256, %s30_s4, [#allocation6], %s153_s26, %s153_s26, %s154_s27  }
  0x26   :  { %145 = dma.done.wait [#allocation3], 256  }
  0x27   :  { %146 = vsyncadd [#allocation3], 4294967040 }
  0x28   :  { %147 = dma.done.wait [#allocation6], 256  }
  0x29   :  { %148 = vsyncadd [#allocation6], 4294967040  ;;  %s156_s14 = smov [#allocation7]   ;;  %vm48_vm0 = vcmask 31744   ;;  %v42_v0 = vld [vmem:[#allocation2] sm:$0xff]  ;;  %v43_v1 = vld [vmem:[#allocation2 + $0x8] sm:$0xff] }
  0x2a   :  { %s56_s15 = sshll.u32 %s156_s14, 4  ;;  %v46_v2 = vld [vmem:[#allocation5] sm:$0xff]  ;;  %44 = vst [vmem:[#allocation7] sm:$0xff] %v42_v0  ;;  %45 = vst [vmem:[#allocation7 + $0x8] sm:$0xff] %v43_v1  ;;  %v47_v3 = vld [vmem:[#allocation5 + $0x8] sm:$0xff]  ;;  %s57_s15 = int_to_ptr.vmem [resolvable:$true] %s56_s15 }
  0x2b   :  { %49 = vst.msk [vmem:[%s233_s3] sm:$0xff] %vm48_vm0, %v46_v2  ;;  %50 = vst.msk [vmem:[%s233_s3 + $0x8] sm:$0xff] %vm48_vm0, %v47_v3  ;;  %s123_s19 = scalar_lea.vmem %s57_s15, 256  ;;  %p128_p5 = scmp.lt.s32.totalorder %s57_s15, %s57_s15 }
  0x2c   :  { %p124_p4 = scmp.ne.s32.totalorder %s57_s15, %s123_s19  ;;  %p129_p6 = scmp.lt.s32.totalorder %s123_s19, %s123_s19 }
  0x2e   :  { %p130_p7 = por %p129_p6, %p128_p5 }
  0x30   :  { %p131_p8 = pnand %p130_p7, %p124_p4 }
  0x32   :  { %134 = shalt.err (!%p131_p8)
}
  0x33   :  { %s135_s22 = scalar_lea.hbm %s232_s2, 256 }
  0x34   :  { %p136_p9 = scmp.ne.s32.totalorder %s232_s2, %s135_s22  ;;  %p139_p10 = scmp.lt.u32.totalorder %s135_s22, %s232_s2 }
  0x36   :  { %p141_p11 = pnand %p139_p10, %p136_p9 }
  0x38   :  { %144 = shalt.err (!%p141_p11)
}
  0x39   :  { %62 = dma.vmem_to_hbm [thread:$0]  %s57_s15, 256, %s232_s2, [#allocation4], %s153_s26, %s153_s26, %s154_s27  }
  0x3a   :  { %149 = dma.done.wait [#allocation4], 256  }
  0x3b   :  { %150 = vsyncadd [#allocation4], 4294967040 }
  0x3c   :  { %70 = vsyncpa [#allocation3], 1 }
  0x3d   :  { %71 = vsyncpa [#allocation6], 1 }
  0x3e   :  { %72 = vsyncpa [#allocation4], 1 }

</bundles_post_ra>
